<compile_context>
chip_gen: v7x
topology: tpu7x:2x2x1
jax: 0.10.0
libtpu: 0.0.40
codegen_flags: <defaults>
</compile_context>

<pallas_src>
import jax
import jax.numpy as jnp
from jax.experimental import pallas as pl
from jax.experimental.pallas import tpu as pltpu


def _round_up(x, m):
    return ((x + m - 1) // m) * m


def _conv_kernel(p_ref, w_ref, b_ref, o_ref):
    # p_ref: (tm, K)          bf16 tap-contiguous patch rows (im2col)
    # w_ref: (K, C_out_pad)   bf16 weights, whole array resident in VMEM
    # b_ref: (1, C_out_pad)   f32 bias row
    # o_ref: (tm, C_out_pad)  lane-dense output tile
    acc = jnp.dot(p_ref[...], w_ref[...], preferred_element_type=jnp.float32)
    o_ref[...] = (acc + b_ref[...]).astype(o_ref.dtype)


def downsample_forward(x_nchw, weight_oihw, bias, *,
                       compute_dtype=jnp.bfloat16, block_m=256):
    """Conv2d(in_ch, out_ch, kernel_size=3, stride=2, padding=1) forward.

    x_nchw:       (N, C_in, H, W)
    weight_oihw:  (C_out, C_in, 3, 3)   (PyTorch layout)
    bias:         (C_out,)
    returns:      (N, C_out, H_out, W_out) with H_out = (H + 1) // 2
    """
    N, C_in, H, W = x_nchw.shape
    C_out = weight_oihw.shape[0]
    out_dtype = x_nchw.dtype
    H_out = (H + 1) // 2            # (H + 2*1 - 3)//2 + 1
    W_out = (W + 1) // 2
    M = N * H_out * W_out           # batch folded into the row axis
    K = 9 * C_in                    # fused contraction depth (9 taps)
    C_out_pad = _round_up(C_out, 128)
    itemsize = jnp.dtype(compute_dtype).itemsize

    # ---- layout pass (one fused XLA op): NCHW->NHWC, conv pad, bf16 cast,
    # stride-2 tap extraction -> tap-contiguous (M, K) patch slab. ----
    x = jnp.transpose(x_nchw, (0, 2, 3, 1)).astype(compute_dtype)      # NHWC
    pad_h = 2 * H_out - H                                               # 0 or 1
    pad_w = 2 * W_out - W
    xp = jnp.pad(x, ((0, 0), (1, pad_h), (1, pad_w), (0, 0)))          # conv pad
    taps = [
        xp[:, kh:kh + 2 * H_out - 1:2, kw:kw + 2 * W_out - 1:2, :]     # (N,Ho,Wo,Cin)
        for kh in range(3) for kw in range(3)
    ]
    patches = jnp.stack(taps, axis=3).reshape(M, K)                    # (M, 9*C_in)

    # ---- M tiling (rows per grid step) ----
    tm = min(block_m, _round_up(M, 8))
    M_pad = _round_up(M, tm)
    if M_pad != M:
        patches = jnp.pad(patches, ((0, M_pad - M), (0, 0)))

    # ---- weights OIHW -> (K, C_out_pad); bias -> (1, C_out_pad) ----
    w_mat = jnp.transpose(weight_oihw, (2, 3, 1, 0)).reshape(K, C_out)
    w_mat = jnp.pad(w_mat, ((0, 0), (0, C_out_pad - C_out))).astype(compute_dtype)
    b_row = jnp.pad(bias.astype(jnp.float32), (0, C_out_pad - C_out)).reshape(1, C_out_pad)

    grid = (M_pad // tm,)

    # ---- compiler params / cost hints ----
    vmem_est = (
        2 * tm * _round_up(K, 128) * itemsize                      # patch block (2 bufs)
        + 2 * tm * C_out_pad * jnp.dtype(out_dtype).itemsize       # output block (2 bufs)
        + _round_up(K, 16) * C_out_pad * itemsize                  # weights (1 copy)
        + 8 * C_out_pad * 4                                        # bias (1 copy)
    )
    compiler_kwargs = {"dimension_semantics": ("parallel",)}
    if vmem_est > 12 * 1024 * 1024:
        # Raise scoped VMEM only when needed; 48 MiB cap leaves headroom on
        # v7x's 64 MiB/TC (v5e/v6e have 128 MiB, so the cap is safe everywhere).
        compiler_kwargs["vmem_limit_bytes"] = int(min(vmem_est * 1.25, 48 * 1024 * 1024))

    flops = 2 * M_pad * K * C_out_pad
    bytes_accessed = int(
        patches.size * itemsize
        + w_mat.size * itemsize
        + b_row.size * 4
        + M_pad * C_out_pad * jnp.dtype(out_dtype).itemsize
    )

    out = pl.pallas_call(
        _conv_kernel,
        out_shape=jax.ShapeDtypeStruct((M_pad, C_out_pad), out_dtype),
        grid_spec=pltpu.PrefetchScalarGridSpec(
            num_scalar_prefetch=0,
            grid=grid,
            in_specs=[
                # Streamed, double-buffered patch rows: last dim = K (full dim).
                pl.BlockSpec((tm, K), lambda m: (m, 0)),
                # Grid-invariant operands: single resident copy in VMEM.
                pl.BlockSpec(memory_space=pltpu.MemorySpace.VMEM),
                pl.BlockSpec(memory_space=pltpu.MemorySpace.VMEM),
            ],
            out_specs=pl.BlockSpec((tm, C_out_pad), lambda m: (m, 0)),
        ),
        compiler_params=pltpu.CompilerParams(**compiler_kwargs),
        cost_estimate=pl.CostEstimate(flops=flops, transcendentals=0,
                                      bytes_accessed=bytes_accessed),
    )(patches, w_mat, b_row)

    out = out[:M, :C_out].reshape(N, H_out, W_out, C_out)
    return jnp.transpose(out, (0, 3, 1, 2))                            # NCHW


if __name__ == "__main__":
    key = jax.random.PRNGKey(0)
    k_x, k_w, k_b = jax.random.split(key, 3)

    # Small shapes consistent with the module: batch=2, in_ch=4, out_ch=8, 16x16.
    N, C_in, C_out, H, W = 2, 4, 8, 16, 16

    x = jax.random.normal(k_x, (N, C_in, H, W), dtype=jnp.float32)
    fan_in = C_in * 3 * 3
    bound = 1.0 / (fan_in ** 0.5)
    weight = jax.random.uniform(k_w, (C_out, C_in, 3, 3),
                                minval=-bound, maxval=bound, dtype=jnp.float32)
    bias = jax.random.uniform(k_b, (C_out,),
                              minval=-bound, maxval=bound, dtype=jnp.float32)

    y = jax.jit(downsample_forward)(x, weight, bias)
    y = jax.block_until_ready(y)

    H_out, W_out = (H + 1) // 2, (W + 1) // 2
    assert y.shape == (N, C_out, H_out, W_out), y.shape

    # Tight check: reference conv fed the same bf16-quantized operands (the
    # kernel accumulates in f32, so only summation order differs).
    xq = x.astype(jnp.bfloat16).astype(jnp.float32)
    wq = weight.astype(jnp.bfloat16).astype(jnp.float32)
    ref_q = jax.lax.conv_general_dilated(
        xq, wq, window_strides=(2, 2), padding=((1, 1), (1, 1)),
        dimension_numbers=("NCHW", "OIHW", "NCHW"),
    ) + bias[None, :, None, None]
    err_q = float(jnp.max(jnp.abs(y - ref_q)))
    assert jnp.allclose(y, ref_q, atol=1e-4, rtol=1e-4), err_q

    # Loose check vs the full-f32 conv (difference is only bf16 operand
    # quantization, well within conv-layer accuracy needs).
    ref = jax.lax.conv_general_dilated(
        x, weight, window_strides=(2, 2), padding=((1, 1), (1, 1)),
        dimension_numbers=("NCHW", "OIHW", "NCHW"),
    ) + bias[None, :, None, None]
    err = float(jnp.max(jnp.abs(y - ref)))
    assert jnp.allclose(y, ref, atol=1e-1, rtol=1e-1), err

    print("KERNEL_OK")
</pallas_src>

<mosaic_0001>
module attributes {stable_mosaic.version = 11 : i64} {
  func.func @_conv_kernel(%arg0: i32, %arg1: memref<128x36xbf16, #tpu.memory_space<vmem>>, %arg2: memref<36x128xbf16, #tpu.memory_space<vmem>>, %arg3: memref<1x128xf32, #tpu.memory_space<vmem>>, %arg4: memref<128x128xf32, #tpu.memory_space<vmem>>) attributes {dimension_semantics = [#tpu.dimension_semantics<parallel>], iteration_bounds = array<i64: 1>, scalar_prefetch = 0 : i64, scratch_operands = 0 : i64, tpu.core_type = #tpu.core_type<tc>, window_params = [{transform_indices = @transform_0, window_bounds = array<i64: 128, 36>}, {pipeline_mode = #tpu.pipeline_mode<synchronous>, transform_indices = @transform_1, window_bounds = array<i64: 36, 128>}, {pipeline_mode = #tpu.pipeline_mode<synchronous>, transform_indices = @transform_2, window_bounds = array<i64: 1, 128>}, {transform_indices = @transform_3, window_bounds = array<i64: 128, 128>}]} {
    %c0 = arith.constant 0 : index
    %c0_0 = arith.constant 0 : index
    %0 = vector.load %arg1[%c0, %c0_0] : memref<128x36xbf16, #tpu.memory_space<vmem>>, vector<128x36xbf16>
    %c0_1 = arith.constant 0 : index
    %c0_2 = arith.constant 0 : index
    %1 = vector.load %arg2[%c0_1, %c0_2] : memref<36x128xbf16, #tpu.memory_space<vmem>>, vector<36x128xbf16>
    %cst = arith.constant dense<0.000000e+00> : vector<128x128xf32>
    %2 = tpu.matmul %0, %1, %cst {dimension_numbers = #tpu.dot_dimension_numbers<[1], [0], [0], [1], [0, 0, 1, 1], [], []>} : vector<128x36xbf16>, vector<36x128xbf16>, vector<128x128xf32> -> vector<128x128xf32>
    %c0_3 = arith.constant 0 : index
    %c0_4 = arith.constant 0 : index
    %3 = vector.load %arg3[%c0_3, %c0_4] : memref<1x128xf32, #tpu.memory_space<vmem>>, vector<1x128xf32>
    %4 = vector.broadcast %3 : vector<1x128xf32> to vector<128x128xf32>
    %5 = arith.addf %2, %4 : vector<128x128xf32>
    %c0_5 = arith.constant 0 : index
    %c0_6 = arith.constant 0 : index
    %6 = vector.load %arg4[%c0_5, %c0_6] : memref<128x128xf32, #tpu.memory_space<vmem>>, vector<128x128xf32>
    tpu.vector_store %arg4[%c0_5, %c0_6], %5 {strides = array<i32>} : memref<128x128xf32, #tpu.memory_space<vmem>>, vector<128x128xf32>,
    return
  }
  func.func @transform_0(%arg0: i32) -> (i32, i32) {
    %c0_i32 = arith.constant 0 : i32
    %c0_i32_0 = arith.constant 0 : i32
    return %arg0, %c0_i32 : i32, i32
  }
  func.func @transform_1(%arg0: i32) -> (i32, i32) {
    %c0_i32 = arith.constant 0 : i32
    %c0_i32_0 = arith.constant 0 : i32
    %c0_i32_1 = arith.constant 0 : i32
    return %c0_i32, %c0_i32_0 : i32, i32
  }
  func.func @transform_2(%arg0: i32) -> (i32, i32) {
    %c0_i32 = arith.constant 0 : i32
    %c0_i32_0 = arith.constant 0 : i32
    %c0_i32_1 = arith.constant 0 : i32
    return %c0_i32, %c0_i32_0 : i32, i32
  }
  func.func @transform_3(%arg0: i32) -> (i32, i32) {
    %c0_i32 = arith.constant 0 : i32
    %c0_i32_0 = arith.constant 0 : i32
    return %arg0, %c0_i32 : i32, i32
  }
}

</mosaic_0001>

<bundles_post_ra>
// kernel: downsample_forward.1
= control target key start
LH: loop header
LB: loop body
LE: loop exit
PB: predicated region body
PF: predicated region fallthrough
CT: control target
= control target key end

     0   :  { %vm98_vm0 = vcmask 293888   ;;  %vm123_vm1 = vcmask 1041408   ;;  %s428_s1 = inlined_call_operand.vmem [shape: bf16[36,128], index: 1, kind: input, shape index: {}]   ;;  %s429_s0 = inlined_call_operand.vmem [shape: bf16[128,36], index: 0, kind: input, shape index: {}]   ;;  %s430_s2 = inlined_call_operand.vmem [shape: f32[1,128], index: 2, kind: input, shape index: {}]   ;;  %s431_s3 = inlined_call_operand.vmem [shape: f32[128,128], index: 3, kind: output, shape index: {}]  }
   0x1   :  { %v305_v0 = vld [vmem:[%s428_s1] sm:$0xff]   ;;  %v306_v1 = vld [vmem:[%s428_s1 + $0x8] sm:$0xff]   ;;  %v307_v2 = vld [vmem:[%s428_s1 + $0x10] ss:$0 sps:$4 sm:$0x33]  }
   0x2   :  { %275 = vmatprep.subr.bf16.mxu0 %v305_v0  ;;  %297 = vmatprep.subr.bf16.mxu1 %v305_v0  ;;  %v308_v3 = vld [vmem:[%s429_s0] sm:$0xff]   ;;  %v125_v5 = vsel %vm123_vm1, %v307_v2, 0  ;;  %v310_v6 = vld [vmem:[%s429_s0 + $0x8] sm:$0xff]   ;;  %v312_v8 = vld [vmem:[%s429_s0 + $0x10] sm:$0xff]  }
   0x3   :  { %276 = vmatpush3.bf16.msra.mxu0 %v305_v0  ;;  %300 = vmatpush3.bf16.msra.mxu1 %v305_v0  ;;  %v309_v4 = vld [vmem:[%s429_s0 + $0x20] sm:$0xff]   ;;  %v311_v7 = vld [vmem:[%s429_s0 + $0x28] sm:$0xff]   ;;  %v313_v9 = vld [vmem:[%s429_s0 + $0x30] sm:$0xff]  }
   0x4   :  { %277 = vmatprep.subr.bf16.mxu0 %v306_v1  ;;  %298 = vmatprep.subr.bf16.mxu1 %v306_v1  ;;  %v314_v10 = vld [vmem:[%s429_s0 + $0x18] sm:$0xff]   ;;  %v244_v12 = vld [vmem:[%s430_s2] ss:$0 sm:$0xff] }
   0x5   :  { %281 = vmatprep.mubr.msk.bf16.mxu0 %vm98_vm0, %v308_v3  ;;  %289 = vmatprep.mubr.msk.bf16.mxu1 %vm98_vm0, %v309_v4  ;;  %v315_v11 = vld [vmem:[%s429_s0 + $0x38] sm:$0xff]  }
   0x7   :  { %278 = vmatpush3.bf16.msra.mxu0 %v306_v1  ;;  %301 = vmatpush3.bf16.msra.mxu1 %v306_v1 }
   0x8   :  { %303 = vmatprep.subr.msk.bf16.mxu0 %vm123_vm1, %v307_v2  ;;  %304 = vmatprep.subr.msk.bf16.mxu1 %vm123_vm1, %v307_v2 }
   0xb   :  { %280 = vmatpush3.bf16.msra.mxu0 %v125_v5  ;;  %302 = vmatpush3.bf16.msra.mxu1 %v125_v5 }
   0xe   :  { %282 = vmatmul.mubr.msk.bf16.vlgmr.msra.gmra.mrb[0].mxu0 %vm98_vm0, %v310_v6  ;;  %290 = vmatmul.mubr.msk.bf16.vlgmr.msra.gmra.mrb[0].mxu1 %vm98_vm0, %v311_v7 }
   0xf   :  { %285 = vmatprep.mubr.msk.bf16.mxu0 %vm98_vm0, %v312_v8  ;;  %293 = vmatprep.mubr.msk.bf16.mxu1 %vm98_vm0, %v313_v9 }
  0x16   :  { %286 = vmatmul.mubr.msk.bf16.gmra.mrb[4].mxu0 %vm98_vm0, %v314_v10  ;;  %294 = vmatmul.mubr.msk.bf16.gmra.mrb[4].mxu1 %vm98_vm0, %v315_v11 }
  0xe1   :  { %v283_v13 = vpop.f32.mrb[0].mxu0  ;;  %v291_v14 = vpop.f32.mrb[0].mxu1 }
  0xe2   :  { %v170_v15 = vadd.f32 %v283_v13, %v244_v12  ;;  %v202_v16 = vadd.f32 %v291_v14, %v244_v12  ;;  %v161_v17 = vpop.f32.mrb[1].mxu0  ;;  %v193_v18 = vpop.f32.mrb[1].mxu1 }
  0xe3   :  { %v162_v19 = vadd.f32 %v244_v12, %v161_v17  ;;  %v194_v20 = vadd.f32 %v244_v12, %v193_v18  ;;  %v284_v21 = vpop.f32.mrb[2].mxu0  ;;  %v292_v22 = vpop.f32.mrb[2].mxu1 }
  0xe4   :  { %226 = vst [vmem:[%s431_s3 + $0x10] sm:$0xff] %v170_v15  ;;  %234 = vst [vmem:[%s431_s3 + $0x50] sm:$0xff] %v202_v16  ;;  %v173_v23 = vadd.f32 %v284_v21, %v244_v12  ;;  %v205_v24 = vadd.f32 %v292_v22, %v244_v12  ;;  %v164_v25 = vpop.f32.mrb[3].mxu0  ;;  %v196_v26 = vpop.f32.mrb[3].mxu1 }
  0xe5   :  { %224 = vst [vmem:[%s431_s3] sm:$0xff] %v162_v19  ;;  %232 = vst [vmem:[%s431_s3 + $0x40] sm:$0xff] %v194_v20  ;;  %v165_v27 = vadd.f32 %v244_v12, %v164_v25  ;;  %v197_v28 = vadd.f32 %v244_v12, %v196_v26 }
  0xe6   :  { %227 = vst [vmem:[%s431_s3 + $0x18] sm:$0xff] %v173_v23  ;;  %235 = vst [vmem:[%s431_s3 + $0x58] sm:$0xff] %v205_v24 }
  0xe7   :  { %225 = vst [vmem:[%s431_s3 + $0x8] sm:$0xff] %v165_v27  ;;  %233 = vst [vmem:[%s431_s3 + $0x48] sm:$0xff] %v197_v28 }
  0xe9   :  { %v287_v29 = vpop.f32.mrb[4].mxu0  ;;  %v295_v30 = vpop.f32.mrb[4].mxu1 }
  0xea   :  { %v186_v31 = vadd.f32 %v287_v29, %v244_v12  ;;  %v218_v32 = vadd.f32 %v295_v30, %v244_v12  ;;  %v177_v33 = vpop.f32.mrb[5].mxu0  ;;  %v209_v34 = vpop.f32.mrb[5].mxu1 }
  0xeb   :  { %v178_v35 = vadd.f32 %v244_v12, %v177_v33  ;;  %v210_v36 = vadd.f32 %v244_v12, %v209_v34  ;;  %v288_v37 = vpop.f32.mrb[6].mxu0  ;;  %v296_v38 = vpop.f32.mrb[6].mxu1 }
  0xec   :  { %230 = vst [vmem:[%s431_s3 + $0x30] sm:$0xff] %v186_v31  ;;  %238 = vst [vmem:[%s431_s3 + $0x70] sm:$0xff] %v218_v32  ;;  %v189_v39 = vadd.f32 %v288_v37, %v244_v12  ;;  %v221_v40 = vadd.f32 %v296_v38, %v244_v12  ;;  %v180_v41 = vpop.f32.mrb[7].mxu0  ;;  %v212_v42 = vpop.f32.mrb[7].mxu1 }
  0xed   :  { %228 = vst [vmem:[%s431_s3 + $0x20] sm:$0xff] %v178_v35  ;;  %236 = vst [vmem:[%s431_s3 + $0x60] sm:$0xff] %v210_v36  ;;  %v181_v43 = vadd.f32 %v244_v12, %v180_v41  ;;  %v213_v44 = vadd.f32 %v244_v12, %v212_v42 }
  0xee   :  { %231 = vst [vmem:[%s431_s3 + $0x38] sm:$0xff] %v189_v39  ;;  %239 = vst [vmem:[%s431_s3 + $0x78] sm:$0xff] %v221_v40 }
  0xef   :  { %229 = vst [vmem:[%s431_s3 + $0x28] sm:$0xff] %v181_v43  ;;  %237 = vst [vmem:[%s431_s3 + $0x68] sm:$0xff] %v213_v44 }

</bundles_post_ra>
